<compile_context>
chip_gen: v6e
topology: v6e:2x2x1
jax: 0.10.0
libtpu: 0.0.40
codegen_flags: <defaults>
</compile_context>

<pallas_src>
import functools

import jax
import jax.numpy as jnp
import numpy as np
from jax.experimental import pallas as pl
from jax.experimental.pallas import tpu as pltpu

_SUBLANE = 8
_DEFAULT_BATCH_TILE = 2048  # 8 MiB f32 output tile at L=1024 (16 MiB dbl-buffered)


def _round_up(x, m):
    return (x + m - 1) // m * m


def _allpass_delay_kernel(delay_ref, out_ref, *, lenfilter, fs):
    """One-hot 'all-pass integer delay' FIR taps, computed entirely in VMEM.

    delay_ref: (TB, 1) f32 -- delay in milliseconds per batch row.
    out_ref:   (TB, lenfilter) -- FIR taps (fftshifted impulse).
    """
    delay_ms = delay_ref[...]                                      # (TB, 1)
    # Stepwise f32 math to mirror torch: round(delay * 0.001 * Fs)
    tau = jnp.round(delay_ms * jnp.float32(0.001) * jnp.float32(fs))
    # fftshift of a one-hot at tau == one-hot at (tau + L//2) mod L.
    # TODO(synk): tau outside [0, lenfilter) wraps via mod; PyTorch would raise.
    target = jnp.mod(tau.astype(jnp.int32) + (lenfilter // 2), lenfilter)   # (TB, 1)
    # (1, L) iota row broadcast against the (TB, 1) target column: only a
    # compare + cast per output vreg; store slot stays the binding slot.
    tap_idx = jax.lax.broadcasted_iota(jnp.int32, (1, lenfilter), 1)        # (1, L)
    out_ref[...] = (tap_idx == target).astype(out_ref.dtype)


def _allpass_jnp(delay2d, lenfilter, fs, out_dtype):
    """Plain-JAX fast path for small batches (lets XLA fuse into the consumer)."""
    tau = jnp.round(delay2d * jnp.float32(0.001) * jnp.float32(fs))
    target = jnp.mod(tau.astype(jnp.int32) + (lenfilter // 2), lenfilter)
    tap_idx = jax.lax.broadcasted_iota(jnp.int32, (1, lenfilter), 1)
    return (tap_idx == target).astype(out_dtype)


def allpass_integer_delay_filter(delay, *, lenfilter=1024, fs=44100,
                                 batch_tile=_DEFAULT_BATCH_TILE,
                                 out_dtype=jnp.float32,
                                 use_pallas=None):
    """JAX/Pallas equivalent of AllPassIntegerDelayFilter.forward.

    delay: scalar or (B,) array of delays in ms.
    Returns: (B, lenfilter) tap matrix (float32 by default, matching PyTorch).
    """
    delay = jnp.asarray(delay, dtype=jnp.float32)
    if delay.ndim == 0:
        delay = delay[None]
    batches = delay.shape[0]
    delay2d = delay.reshape(batches, 1)

    if use_pallas is None:
        # For tiny batches the fixed pallas_call overhead dominates; emit a
        # fusable jnp one-hot instead (XLA may elide materializing it at all).
        use_pallas = batches >= 256
    if not use_pallas:
        return _allpass_jnp(delay2d, lenfilter, fs, out_dtype)

    # ---- batch-tile selection (sublane-aligned, no padding / post-slice) ----
    tb = max(_SUBLANE, min(batch_tile, batches))
    tb = _round_up(tb, _SUBLANE)
    # Prefer >= 2 grid steps so ("parallel",) can shard across v7x's two TCs.
    if pl.cdiv(batches, tb) < 2 and batches >= 2 * _SUBLANE:
        tb = _round_up(pl.cdiv(batches, 2), _SUBLANE)
    grid = (pl.cdiv(batches, tb),)

    out_itemsize = jnp.dtype(out_dtype).itemsize
    # Explicit VMEM budget: 2x double-buffered output tile + 2x lane-padded
    # (tb, 1) input tile, with headroom.  Keeps large tiles working on v5e's
    # 16 MiB scoped default; well under v7x's 64 MiB physical VMEM.
    out_tile_bytes = tb * lenfilter * out_itemsize
    in_tile_bytes = tb * 128 * 4          # (tb, 1) f32 is lane-padded to 128
    vmem_limit = int(2 * (out_tile_bytes + in_tile_bytes) * 1.25) + (1 << 20)
    vmem_limit = max(16 << 20, min(vmem_limit, 64 << 20))

    kernel = functools.partial(_allpass_delay_kernel, lenfilter=lenfilter, fs=fs)
    cost = pl.CostEstimate(
        flops=batches * lenfilter,
        transcendentals=0,
        bytes_accessed=batches * lenfilter * out_itemsize + batches * 4)

    taps = pl.pallas_call(
        kernel,
        out_shape=jax.ShapeDtypeStruct((batches, lenfilter), out_dtype),
        grid=grid,
        in_specs=[pl.BlockSpec((tb, 1), lambda i: (i, 0))],
        out_specs=pl.BlockSpec((tb, lenfilter), lambda i: (i, 0)),
        compiler_params=pltpu.CompilerParams(
            dimension_semantics=("parallel",),
            vmem_limit_bytes=vmem_limit),
        cost_estimate=cost,
    )(delay2d)
    return taps


def _reference_numpy(delay, lenfilter=1024, fs=44100):
    delay = np.atleast_1d(np.asarray(delay, dtype=np.float32))
    b = delay.shape[0]
    htaps = np.zeros((b, lenfilter), dtype=np.float32)
    for i in range(b):
        # np.round matches torch.round (round half to even)
        tau = int(np.round(delay[i] * np.float32(0.001) * np.float32(fs)))
        htaps[i, tau] = 1.0
    return np.fft.fftshift(htaps, axes=1)


if __name__ == "__main__":
    LENFILTER = 1024
    FS = 44100

    key = jax.random.PRNGKey(0)

    # Small batch, forced through the Pallas kernel (single ragged block).
    B = 4
    delay_ms = jax.random.uniform(key, (B,), dtype=jnp.float32,
                                  minval=0.0, maxval=20.0)
    taps = allpass_integer_delay_filter(
        delay_ms, lenfilter=LENFILTER, fs=FS, use_pallas=True)
    taps = jax.block_until_ready(taps)
    expected = _reference_numpy(np.asarray(delay_ms), LENFILTER, FS)
    np.testing.assert_allclose(np.asarray(taps), expected, rtol=0, atol=0)

    # Non-multiple-of-tile batch with an explicit small tile: exercises the
    # multi-step grid + masked ragged last block (no padding, no post-slice).
    B2 = 20
    delay_ms2 = jax.random.uniform(jax.random.PRNGKey(1), (B2,),
                                   dtype=jnp.float32, minval=0.0, maxval=20.0)
    taps2 = allpass_integer_delay_filter(
        delay_ms2, lenfilter=LENFILTER, fs=FS, batch_tile=8, use_pallas=True)
    taps2 = jax.block_until_ready(taps2)
    expected2 = _reference_numpy(np.asarray(delay_ms2), LENFILTER, FS)
    np.testing.assert_allclose(np.asarray(taps2), expected2, rtol=0, atol=0)

    # Default (large) tile with a batch that fits one tile: exercises the
    # ">= 2 grid steps" split so both v7x TCs get work, plus ragged masking.
    B3 = 40
    delay_ms3 = jax.random.uniform(jax.random.PRNGKey(2), (B3,),
                                   dtype=jnp.float32, minval=0.0, maxval=20.0)
    taps3 = allpass_integer_delay_filter(
        delay_ms3, lenfilter=LENFILTER, fs=FS, use_pallas=True)
    taps3 = jax.block_until_ready(taps3)
    expected3 = _reference_numpy(np.asarray(delay_ms3), LENFILTER, FS)
    np.testing.assert_allclose(np.asarray(taps3), expected3, rtol=0, atol=0)

    # Small-batch jnp fast path (default dispatch) also matches.
    taps4 = jax.block_until_ready(
        allpass_integer_delay_filter(delay_ms, lenfilter=LENFILTER, fs=FS))
    np.testing.assert_allclose(np.asarray(taps4), expected, rtol=0, atol=0)

    print("KERNEL_OK")
</pallas_src>

<mosaic_0001>
module attributes {stable_mosaic.version = 11 : i64} {
  func.func @_allpass_delay_kernel(%arg0: i32, %arg1: memref<8x1xf32, #tpu.memory_space<vmem>>, %arg2: memref<8x1024xf32, #tpu.memory_space<vmem>>) attributes {dimension_semantics = [#tpu.dimension_semantics<parallel>], iteration_bounds = array<i64: 1>, scalar_prefetch = 0 : i64, scratch_operands = 0 : i64, tpu.core_type = #tpu.core_type<tc>, window_params = [{transform_indices = @transform_0, window_bounds = array<i64: 8, 1>}, {transform_indices = @transform_1, window_bounds = array<i64: 8, 1024>}]} {
    %c0 = arith.constant 0 : index
    %c0_0 = arith.constant 0 : index
    %0 = vector.load %arg1[%c0, %c0_0] : memref<8x1xf32, #tpu.memory_space<vmem>>, vector<8x1xf32>
    %cst = arith.constant 1.000000e-03 : f32
    %1 = vector.broadcast %cst : f32 to vector<8x1xf32>
    %2 = arith.mulf %0, %1 : vector<8x1xf32>
    %cst_1 = arith.constant 4.410000e+04 : f32
    %3 = vector.broadcast %cst_1 : f32 to vector<8x1xf32>
    %4 = arith.mulf %2, %3 : vector<8x1xf32>
    %5 = math.roundeven %4 : vector<8x1xf32>
    %6 = arith.fptosi %5 : vector<8x1xf32> to vector<8x1xi32>
    %c512_i32 = arith.constant 512 : i32
    %7 = vector.broadcast %c512_i32 : i32 to vector<8x1xi32>
    %8 = arith.addi %6, %7 : vector<8x1xi32>
    %c1024_i32 = arith.constant 1024 : i32
    %c0_i32 = arith.constant 0 : i32
    %9 = arith.cmpi eq, %c1024_i32, %c0_i32 : i32
    %c1_i32 = arith.constant 1 : i32
    %10 = arith.select %9, %c1_i32, %c1024_i32 : i32
    %11 = vector.broadcast %10 : i32 to vector<8x1xi32>
    %12 = arith.remsi %8, %11 : vector<8x1xi32>
    %c0_i32_2 = arith.constant 0 : i32
    %13 = vector.broadcast %c0_i32_2 : i32 to vector<8x1xi32>
    %14 = arith.cmpi ne, %12, %13 : vector<8x1xi32>
    %c0_i32_3 = arith.constant 0 : i32
    %15 = vector.broadcast %c0_i32_3 : i32 to vector<8x1xi32>
    %16 = arith.cmpi slt, %12, %15 : vector<8x1xi32>
    %c0_i32_4 = arith.constant 0 : i32
    %17 = arith.cmpi slt, %10, %c0_i32_4 : i32
    %18 = vector.broadcast %17 : i1 to vector<8x1xi1>
    %19 = vector.broadcast %18 : vector<8x1xi1> to vector<8x1xi1>
    %20 = arith.xori %16, %19 : vector<8x1xi1>
    %21 = arith.andi %20, %14 : vector<8x1xi1>
    %22 = vector.broadcast %10 : i32 to vector<8x1xi32>
    %23 = arith.addi %12, %22 : vector<8x1xi32>
    %24 = arith.select %21, %23, %12 : vector<8x1xi1>, vector<8x1xi32>
    %25 = tpu.iota {dimensions = array<i32: 1>} : vector<1x1024xi32>
    %26 = vector.broadcast %25 : vector<1x1024xi32> to vector<8x1024xi32>
    %27 = vector.broadcast %24 : vector<8x1xi32> to vector<8x1024xi32>
    %28 = arith.cmpi eq, %26, %27 : vector<8x1024xi32>
    %29 = arith.extui %28 : vector<8x1024xi1> to vector<8x1024xi32>
    %30 = arith.sitofp %29 : vector<8x1024xi32> to vector<8x1024xf32>
    %c0_5 = arith.constant 0 : index
    %c0_6 = arith.constant 0 : index
    %31 = vector.load %arg2[%c0_5, %c0_6] : memref<8x1024xf32, #tpu.memory_space<vmem>>, vector<8x1024xf32>
    tpu.vector_store %arg2[%c0_5, %c0_6], %30 {strides = array<i32>} : memref<8x1024xf32, #tpu.memory_space<vmem>>, vector<8x1024xf32>,
    return
  }
  func.func @transform_0(%arg0: i32) -> (i32, i32) {
    %c0_i32 = arith.constant 0 : i32
    %c0_i32_0 = arith.constant 0 : i32
    return %arg0, %c0_i32 : i32, i32
  }
  func.func @transform_1(%arg0: i32) -> (i32, i32) {
    %c0_i32 = arith.constant 0 : i32
    %c0_i32_0 = arith.constant 0 : i32
    return %arg0, %c0_i32 : i32, i32
  }
}

</mosaic_0001>

<bundles_post_ra>
// kernel: tpu_custom_call.1
= control target key start
LH: loop header
LB: loop body
LE: loop exit
PB: predicated region body
PF: predicated region fallthrough
CT: control target
= control target key end

     0   :  { %s171_s0 = inlined_call_operand.vmem [shape: f32[4,1], index: 0, kind: input, shape index: {}]   ;;  %s172_s1 = inlined_call_operand.hbm [shape: f32[4,1024], index: 1, kind: output, shape index: {}]  }
   0x1   :  { %v9_v0 = vld [vmem:[%s171_s0] sm:$0xff] }
   0x2   :  { %6 = vsyncpa [#allocation3], 0  ;;  %v150_v1 = vmov 0   ;;  %v10_v2 = vmul.f32 0.001, %v9_v0  ;;  %v26_v13 = vlaneseq  ;;  %v151_v23 = vmov 0.0  }
   0x3   :  { %127 = vset.pattern.permute.xlu0 %v150_v1 }
   0x4   :  { %v11_v3 = vmul.f32 44100.0, %v10_v2  ;;  %v27_v14 = vand.u32 127, %v26_v13 }
   0x6   :  { %v121_v4 = vcvt.f32.s32 %v11_v3  ;;  %v28_v15 = vadd.s32 128, %v27_v14  ;;  %v29_v16 = vadd.s32 256, %v27_v14  ;;  %v30_v17 = vadd.s32 384, %v27_v14 }
   0x7   :  { %v31_v18 = vadd.s32 512, %v27_v14  ;;  %v32_v19 = vadd.s32 640, %v27_v14  ;;  %v33_v20 = vadd.s32 768, %v27_v14  ;;  %v34_v21 = vadd.s32 896, %v27_v14 }
   0x8   :  { %v13_v5 = vadd.s32 512, %v121_v4 }
   0xa   :  { %v15_v6 = vsub.s32 0, %v13_v5  ;;  %vm14_vm0 = vcmp.lt.s32.totalorder %v13_v5, 0 }
   0xc   :  { %v110_v7 = vmin.u32 %v15_v6, %v13_v5 }
   0xe   :  { %v18_v8 = vand.u32 1023, %v110_v7 }
  0x10   :  { %v19_v9 = vsub.s32 0, %v18_v8 }
  0x12   :  { %v20_v10 = vsel %vm14_vm0, %v19_v9, %v18_v8 }
  0x13   :  { %vm21_vm1 = vcmp.ne.s32.totalorder %v20_v10, 0  ;;  %vm22_vm2 = vcmp.lt.s32.totalorder %v20_v10, 0  ;;  %v24_v11 = vadd.s32 1024, %v20_v10 }
  0x14   :  { %vm23_vm3 = vmand %vm22_vm2, %vm21_vm1 }
  0x15   :  { %v25_v12 = vsel %vm23_vm3, %v24_v11, %v20_v10 }
  0x16   :  { %36 = vperm.xlu0 %127, %v25_v12  }
  0x91   :  { %v37_v22 = vpop.permute.xlu0 %36 }
  0x92   :  { %vm38_vm4 = vcmp.eq.s32.totalorder %v27_v14, %v37_v22  ;;  %vm39_vm5 = vcmp.eq.s32.totalorder %v28_v15, %v37_v22  ;;  %vm40_vm6 = vcmp.eq.s32.totalorder %v29_v16, %v37_v22  ;;  %vm41_vm7 = vcmp.eq.s32.totalorder %v30_v17, %v37_v22 }
  0x93   :  { %vm42_vm8 = vcmp.eq.s32.totalorder %v31_v18, %v37_v22  ;;  %vm43_vm9 = vcmp.eq.s32.totalorder %v32_v19, %v37_v22  ;;  %vm44_vm10 = vcmp.eq.s32.totalorder %v33_v20, %v37_v22  ;;  %vm45_vm11 = vcmp.eq.s32.totalorder %v34_v21, %v37_v22 }
  0x94   :  { %v111_v24 = vsel %vm38_vm4, 1.0, %v151_v23  ;;  %v112_v25 = vsel %vm39_vm5, 1.0, %v151_v23  ;;  %v113_v26 = vsel %vm40_vm6, 1.0, %v151_v23  ;;  %v114_v27 = vsel %vm41_vm7, 1.0, %v151_v23 }
  0x95   :  { %v115_v28 = vsel %vm42_vm8, 1.0, %v151_v23  ;;  %v116_v29 = vsel %vm43_vm9, 1.0, %v151_v23  ;;  %v117_v30 = vsel %vm44_vm10, 1.0, %v151_v23  ;;  %v118_v31 = vsel %vm45_vm11, 1.0, %v151_v23 }
  0x96   :  { %v70_v32 = vcombine.low %v111_v24, %v112_v25  ;;  %v71_v33 = vcombine.high %v111_v24, %v112_v25  ;;  %v72_v34 = vcombine.low %v113_v26, %v114_v27  ;;  %v73_v35 = vcombine.high %v113_v26, %v114_v27 }
  0x97   :  { %v74_v36 = vcombine.low %v115_v28, %v116_v29  ;;  %v75_v37 = vcombine.high %v115_v28, %v116_v29  ;;  %v76_v38 = vcombine.low %v117_v30, %v118_v31  ;;  %v77_v39 = vcombine.high %v117_v30, %v118_v31 }
  0x98   :  { %86 = vst [vmem:[#allocation2] sm:$0xff] %v70_v32  ;;  %87 = vst [vmem:[#allocation2 + $0x8] sm:$0xff] %v72_v34 }
  0x99   :  { %90 = vst [vmem:[#allocation2 + $0x20] sm:$0xff] %v71_v33  ;;  %91 = vst [vmem:[#allocation2 + $0x28] sm:$0xff] %v73_v35 }
  0x9a   :  { %88 = vst [vmem:[#allocation2 + $0x10] sm:$0xff] %v74_v36  ;;  %89 = vst [vmem:[#allocation2 + $0x18] sm:$0xff] %v76_v38 }
  0x9b   :  { %92 = vst [vmem:[#allocation2 + $0x30] sm:$0xff] %v75_v37  ;;  %93 = vst [vmem:[#allocation2 + $0x38] sm:$0xff] %v77_v39 }
  0x9c   :  { %98 = vsyncadd [#allocation3], 512  ;;  %s152_s0 = smov [#allocation2]  }
  0x9d   :  { %s99_s8 = sshll.u32 %s152_s0, 4  ;;  %s100_s8 = int_to_ptr.vmem [resolvable:$true] %s99_s8 }
  0x9e   :  { %s128_s9 = scalar_lea.vmem %s100_s8, 512  ;;  %s132_s10 = scalar_lea.vmem %s100_s8, 1024 }
  0x9f   :  { %p129_p0 = scmp.ne.s32.totalorder %s100_s8, %s128_s9  ;;  %p133_p1 = scmp.lt.s32.totalorder %s100_s8, %s100_s8 }
  0xa0   :  { %p134_p2 = scmp.lt.s32.totalorder %s132_s10, %s128_s9 }
  0xa2   :  { %p135_p3 = por %p134_p2, %p133_p1 }
  0xa4   :  { %p136_p4 = pnand %p135_p3, %p129_p0 }
  0xa6   :  { %139 = shalt.err (!%p136_p4)
}
  0xa7   :  { %s153_s11 = smov 512   ;;  %s154_s12 = smov 32  }
  0xa8   :  { %105 = dma.vmem_to_hbm [thread:$0]  %s100_s8, 512, %s172_s1, [#allocation3], %s153_s11, %s153_s11, %s154_s12  }
  0xa9   :  { %148 = dma.done.wait [#allocation3], 1024  }
  0xaa   :  { %149 = vsyncadd [#allocation3], 4294966272 }
  0xab   :  { %109 = vsyncpa [#allocation3], 1 }

</bundles_post_ra>
